<compile_context>
chip_gen: v7x
topology: tpu7x:2x2x1
jax: 0.10.0
libtpu: 0.0.40
codegen_flags: <defaults>
</compile_context>

<pallas_src>
import functools

import jax
import jax.numpy as jnp
from jax.experimental import pallas as pl
from jax.experimental.pallas import tpu as pltpu  # noqa: F401

TOPK_K = 20          # torch.topk(defen, k=20) in my_loss
LRELU_SLOPE = 0.1    # F.leaky_relu(x, 0.1) in AAE.py
EPS = 1e-5


def _leaky_relu(v):
    return jnp.where(v > 0, v, LRELU_SLOPE * v)


def _round_up(n, m):
    return ((n + m - 1) // m) * m


# ----------------------------- kernels ------------------------------------- #

def ae_fused_kernel(x_ref, d_ref, w_ref, b_ref, y_ref, z_ref, loss_ref, *,
                    dim_data, topk):
    """Whole AE forward + my_loss in one grid-less Pallas invocation.

    All feature axes are zero-padded to P (lane dense); the padded math is exact.
      x_ref   : (B, P)   zero-padded input batch
      d_ref   : (1, P)   zero-padded data_input row (== torch.transpose(d,1,0))
      w_ref   : (6, P, P) zero-padded weights (bf16 by default)
      b_ref   : (6, P)   zero-padded biases (f32)
      y_ref   : (B, P)   decoder output (padded cols are exactly 0)
      z_ref   : (B, P)   encoder output (padded cols are exactly 0)
      loss_ref: (1, 1)   distance_loss (torch.mean of a scalar is identity)
    """
    x = x_ref[...]                       # (B, P) f32
    d = d_ref[...]                       # (1, P) f32
    B = x.shape[0]
    cdt = w_ref.dtype                    # bf16 weights -> bf16 MXU inputs

    def dense(h, i):
        # Full P-wide contraction: padded input cols and padded weight rows are
        # zero, so this equals the unpadded matmul exactly. f32 accumulate.
        out = jnp.dot(h.astype(cdt), w_ref[i], preferred_element_type=jnp.float32)
        return out + b_ref[i:i + 1, :].astype(jnp.float32)

    # ---- MLP_encoder ----
    h = _leaky_relu(dense(x, 0))
    h = _leaky_relu(dense(h, 1))
    z = dense(h, 2)                      # (B, P); cols >= dim_z are exactly 0
    z_ref[...] = z.astype(z_ref.dtype)   # lane-dense store, no mask

    # ---- MLP_decoder ----
    h = _leaky_relu(dense(z, 3))
    h = _leaky_relu(dense(h, 4))
    y = jnp.tanh(dense(h, 5))            # padded cols: tanh(0) == 0
    y_ref[...] = y.astype(y_ref.dtype)   # lane-dense store, no mask

    # ---- my_loss (fully fused; everything stays in vregs) ----
    A = jnp.sum(y * d, axis=1, keepdims=True)               # (B, 1)
    Bn = jnp.sqrt(jnp.sum(y * y, axis=1, keepdims=True))    # (B, 1) row ||y||_2
    C = jnp.sqrt(jnp.sum(d * d, keepdims=True))             # (1, 1) ||d||_2
    defen = A / (Bn * C + EPS)                               # exact divide (parity)

    # --- sum of the top-k defen values: one-shot rank selection (no loop) ---
    # Row view of defen via an aligned (B,128)->(128,B) transpose (B % 8 == 0),
    # so both orientations use bit-identical values.
    defen_row = jnp.transpose(jnp.broadcast_to(defen, (B, 128)))[0:1, :]   # (1, B)
    i_idx = jax.lax.broadcasted_iota(jnp.int32, (B, B), 0)
    j_idx = jax.lax.broadcasted_iota(jnp.int32, (B, B), 1)
    # better[i, j] == "element j strictly better than element i" (index tie-break)
    better = (defen_row > defen) | ((defen_row == defen) & (j_idx < i_idx))
    rank = jnp.sum(better.astype(jnp.float32), axis=1, keepdims=True)      # (B, 1)
    sam_loss = jnp.sum(jnp.where(rank < topk, defen, 0.0), keepdims=True)  # (1, 1)

    # mse over the logical B*D elements (padded cols of y and x are both 0).
    mse = jnp.sum((y - x) ** 2, keepdims=True) * (1.0 / (B * dim_data))
    loss_ref[...] = (mse + 0.1 * sam_loss).astype(loss_ref.dtype)


def ae_encoder_kernel(x_ref, w_ref, b_ref, z_ref):
    """Encoder-only path (with_decoder=False); all I/O lane dense."""
    x = x_ref[...]
    cdt = w_ref.dtype

    def dense(h, i):
        out = jnp.dot(h.astype(cdt), w_ref[i], preferred_element_type=jnp.float32)
        return out + b_ref[i:i + 1, :].astype(jnp.float32)

    h = _leaky_relu(dense(x, 0))
    h = _leaky_relu(dense(h, 1))
    z_ref[...] = dense(h, 2).astype(z_ref.dtype)


# ----------------------------- params & wrapper ----------------------------- #

def init_params(key, dim_data, dim_z, n_hidden, param_dtype=jnp.bfloat16):
    """PyTorch-style Linear init U(-1/sqrt(fan_in), +1/sqrt(fan_in)), packed into
    two zero-padded lane-dense blobs.  Returns (w_blob, b_blob, raw); `raw` is
    the unpadded f32 (W, b) list used by the pure-JAX reference."""
    layer_dims = [
        (dim_data, n_hidden), (n_hidden, n_hidden), (n_hidden, dim_z),   # encoder
        (dim_z, n_hidden), (n_hidden, n_hidden), (n_hidden, dim_data),   # decoder
    ]
    P = _round_up(max(dim_data, dim_z, n_hidden), 128)
    w_blob = jnp.zeros((6, P, P), param_dtype)
    b_blob = jnp.zeros((6, P), jnp.float32)
    raw = []
    for i, (fan_in, fan_out) in enumerate(layer_dims):
        key, kw, kb = jax.random.split(key, 3)
        bound = 1.0 / (fan_in ** 0.5)
        W = jax.random.uniform(kw, (fan_in, fan_out), jnp.float32, -bound, bound)
        b = jax.random.uniform(kb, (fan_out,), jnp.float32, -bound, bound)
        w_blob = w_blob.at[i, :fan_in, :fan_out].set(W.astype(param_dtype))
        b_blob = b_blob.at[i, :fan_out].set(b)
        raw.append((W, b))
    return w_blob, b_blob, raw


@functools.partial(jax.jit, static_argnames=("dim_z", "with_decoder"))
def ae_forward(x, data_input, w_blob, b_blob, *, dim_z, with_decoder=True):
    B, D = x.shape
    P = w_blob.shape[1]
    wbytes = int(w_blob.size * w_blob.dtype.itemsize)

    # Lane-dense zero padding so the kernel never slices / masks stores.
    x_p = jnp.pad(x, ((0, 0), (0, P - D)))

    if not with_decoder:
        cost = pl.CostEstimate(
            flops=int(2 * B * P * P * 3),
            transcendentals=0,
            bytes_accessed=int(4 * B * P * 2 + wbytes + 4 * 6 * P))
        z_p = pl.pallas_call(
            ae_encoder_kernel,
            out_shape=jax.ShapeDtypeStruct((B, P), jnp.float32),
            cost_estimate=cost,
        )(x_p, w_blob, b_blob)
        return z_p[:, :dim_z]

    # torch.transpose(data_input, 1, 0) of a (D,1) column == a (1,D) row.
    d_row = jnp.pad(data_input.reshape(1, D), ((0, 0), (0, P - D)))
    k = min(TOPK_K, B)   # torch.topk(k=20) requires B >= 20; clamp instead of raising

    cost = pl.CostEstimate(
        flops=int(2 * B * P * P * 6 + 6 * B * B + 8 * B * P),
        transcendentals=int(B * P + 2 * B + 2),
        bytes_accessed=int(4 * B * P * 3 + 4 * P + wbytes + 4 * 6 * P + 4))

    y_p, z_p, loss = pl.pallas_call(
        functools.partial(ae_fused_kernel, dim_data=D, topk=k),
        out_shape=(jax.ShapeDtypeStruct((B, P), jnp.float32),
                   jax.ShapeDtypeStruct((B, P), jnp.float32),
                   jax.ShapeDtypeStruct((1, 1), jnp.float32)),
        cost_estimate=cost,
    )(x_p, d_row, w_blob, b_blob)

    R_loss = loss[0, 0]   # torch.mean(torch.mean(scalar)) is that scalar
    return y_p[:, :D], z_p[:, :dim_z], R_loss


# ----------------------------- pure-JAX reference --------------------------- #

def ref_forward(x, data_input, raw):
    lrelu = lambda v: jnp.where(v > 0, v, LRELU_SLOPE * v)
    (W1, b1), (W2, b2), (W3, b3), (W4, b4), (W5, b5), (W6, b6) = raw
    h = lrelu(x @ W1 + b1)
    h = lrelu(h @ W2 + b2)
    z = h @ W3 + b3
    h = lrelu(z @ W4 + b4)
    h = lrelu(h @ W5 + b5)
    y = jnp.tanh(h @ W6 + b6)
    d = data_input.reshape(1, -1)
    A = jnp.sum(y * d, axis=1)
    Bn = jnp.sqrt(jnp.sum(y * y, axis=1))
    C = jnp.sqrt(jnp.sum(d * d))
    defen = A / (Bn * C + EPS)
    sam = jnp.sum(jax.lax.top_k(defen, TOPK_K)[0])
    mse = jnp.mean((y - x) ** 2)
    return y, z, mse + 0.1 * sam


# ------------------------------- main ---------------------------------------- #

if __name__ == "__main__":
    # batch must be >= 20 (torch.topk k=20) and a multiple of 8 for the aligned
    # in-kernel transpose; 32 satisfies both.
    B, DIM_DATA, DIM_Z, N_HIDDEN = 32, 64, 16, 128

    key = jax.random.PRNGKey(0)
    kp, kx, kd = jax.random.split(key, 3)

    # bf16 weight blob (default); biases / activations / loss math stay f32.
    w_blob, b_blob, raw = init_params(kp, DIM_DATA, DIM_Z, N_HIDDEN)
    x = jax.random.normal(kx, (B, DIM_DATA), jnp.float32)
    data_input = jax.random.normal(kd, (DIM_DATA, 1), jnp.float32)

    y, z, R_loss = ae_forward(x, data_input, w_blob, b_blob,
                              dim_z=DIM_Z, with_decoder=True)
    z_only = ae_forward(x, data_input, w_blob, b_blob,
                        dim_z=DIM_Z, with_decoder=False)
    jax.block_until_ready((y, z, R_loss, z_only))

    assert y.shape == (B, DIM_DATA) and z.shape == (B, DIM_Z)
    assert R_loss.shape == () and z_only.shape == (B, DIM_Z)

    # pure-JAX reference check (tolerances cover bf16 weight storage plus the
    # bf16 MXU passes both paths take at default precision).
    y_r, z_r, loss_r = ref_forward(x, data_input, raw)
    TOL = 3e-2
    assert jnp.allclose(y, y_r, rtol=TOL, atol=TOL), "decoder output mismatch"
    assert jnp.allclose(z, z_r, rtol=TOL, atol=TOL), "encoder output mismatch"
    assert jnp.allclose(z_only, z_r, rtol=TOL, atol=TOL), "encoder-only path mismatch"
    assert abs(float(R_loss) - float(loss_r)) <= TOL * max(1.0, abs(float(loss_r))), "loss mismatch"

    print("KERNEL_OK")
</pallas_src>

<mosaic_0001>
module attributes {stable_mosaic.version = 11 : i64} {
  func.func @ae_fused_kernel(%arg0: memref<32x128xf32, #tpu.memory_space<vmem>>, %arg1: memref<1x128xf32, #tpu.memory_space<vmem>>, %arg2: memref<6x128x128xbf16, #tpu.memory_space<vmem>>, %arg3: memref<6x128xf32, #tpu.memory_space<vmem>>, %arg4: memref<32x128xf32, #tpu.memory_space<vmem>>, %arg5: memref<32x128xf32, #tpu.memory_space<vmem>>, %arg6: memref<1x1xf32, #tpu.memory_space<vmem>>) attributes {dimension_semantics = [], scalar_prefetch = 0 : i64, scratch_operands = 0 : i64, tpu.core_type = #tpu.core_type<tc>} {
    %c0 = arith.constant 0 : index
    %c0_0 = arith.constant 0 : index
    %0 = vector.load %arg0[%c0, %c0_0] : memref<32x128xf32, #tpu.memory_space<vmem>>, vector<32x128xf32>
    %c0_1 = arith.constant 0 : index
    %c0_2 = arith.constant 0 : index
    %1 = vector.load %arg1[%c0_1, %c0_2] : memref<1x128xf32, #tpu.memory_space<vmem>>, vector<1x128xf32>
    %2 = arith.truncf %0 : vector<32x128xf32> to vector<32x128xbf16>
    %c0_3 = arith.constant 0 : index
    %c0_4 = arith.constant 0 : index
    %c0_5 = arith.constant 0 : index
    %3 = vector.load %arg2[%c0_3, %c0_4, %c0_5] : memref<6x128x128xbf16, #tpu.memory_space<vmem>>, vector<1x128x128xbf16>
    %4 = vector.shape_cast %3 : vector<1x128x128xbf16> to vector<128x128xbf16>
    %cst = arith.constant dense<0.000000e+00> : vector<32x128xf32>
    %5 = tpu.matmul %2, %4, %cst {dimension_numbers = #tpu.dot_dimension_numbers<[1], [0], [0], [1], [0, 0, 1, 1], [], []>} : vector<32x128xbf16>, vector<128x128xbf16>, vector<32x128xf32> -> vector<32x128xf32>
    %c0_6 = arith.constant 0 : index
    %c0_7 = arith.constant 0 : index
    %6 = vector.load %arg3[%c0_6, %c0_7] : memref<6x128xf32, #tpu.memory_space<vmem>>, vector<1x128xf32>
    %7 = vector.broadcast %6 : vector<1x128xf32> to vector<32x128xf32>
    %8 = arith.addf %5, %7 : vector<32x128xf32>
    %cst_8 = arith.constant 0.000000e+00 : f32
    %9 = vector.broadcast %cst_8 : f32 to vector<32x128xf32>
    %10 = arith.cmpf ogt, %8, %9 : vector<32x128xf32>
    %cst_9 = arith.constant 1.000000e-01 : f32
    %11 = vector.broadcast %cst_9 : f32 to vector<32x128xf32>
    %12 = arith.mulf %11, %8 : vector<32x128xf32>
    %13 = arith.select %10, %8, %12 : vector<32x128xi1>, vector<32x128xf32>
    %14 = arith.truncf %13 : vector<32x128xf32> to vector<32x128xbf16>
    %c1 = arith.constant 1 : index
    %c0_10 = arith.constant 0 : index
    %c0_11 = arith.constant 0 : index
    %15 = vector.load %arg2[%c1, %c0_10, %c0_11] : memref<6x128x128xbf16, #tpu.memory_space<vmem>>, vector<1x128x128xbf16>
    %16 = vector.shape_cast %15 : vector<1x128x128xbf16> to vector<128x128xbf16>
    %cst_12 = arith.constant dense<0.000000e+00> : vector<32x128xf32>
    %17 = tpu.matmul %14, %16, %cst_12 {dimension_numbers = #tpu.dot_dimension_numbers<[1], [0], [0], [1], [0, 0, 1, 1], [], []>} : vector<32x128xbf16>, vector<128x128xbf16>, vector<32x128xf32> -> vector<32x128xf32>
    %c1_13 = arith.constant 1 : index
    %c0_14 = arith.constant 0 : index
    %18 = vector.load %arg3[%c1_13, %c0_14] : memref<6x128xf32, #tpu.memory_space<vmem>>, vector<1x128xf32>
    %19 = vector.broadcast %18 : vector<1x128xf32> to vector<32x128xf32>
    %20 = arith.addf %17, %19 : vector<32x128xf32>
    %cst_15 = arith.constant 0.000000e+00 : f32
    %21 = vector.broadcast %cst_15 : f32 to vector<32x128xf32>
    %22 = arith.cmpf ogt, %20, %21 : vector<32x128xf32>
    %cst_16 = arith.constant 1.000000e-01 : f32
    %23 = vector.broadcast %cst_16 : f32 to vector<32x128xf32>
    %24 = arith.mulf %23, %20 : vector<32x128xf32>
    %25 = arith.select %22, %20, %24 : vector<32x128xi1>, vector<32x128xf32>
    %26 = arith.truncf %25 : vector<32x128xf32> to vector<32x128xbf16>
    %c2 = arith.constant 2 : index
    %c0_17 = arith.constant 0 : index
    %c0_18 = arith.constant 0 : index
    %27 = vector.load %arg2[%c2, %c0_17, %c0_18] : memref<6x128x128xbf16, #tpu.memory_space<vmem>>, vector<1x128x128xbf16>
    %28 = vector.shape_cast %27 : vector<1x128x128xbf16> to vector<128x128xbf16>
    %cst_19 = arith.constant dense<0.000000e+00> : vector<32x128xf32>
    %29 = tpu.matmul %26, %28, %cst_19 {dimension_numbers = #tpu.dot_dimension_numbers<[1], [0], [0], [1], [0, 0, 1, 1], [], []>} : vector<32x128xbf16>, vector<128x128xbf16>, vector<32x128xf32> -> vector<32x128xf32>
    %c2_20 = arith.constant 2 : index
    %c0_21 = arith.constant 0 : index
    %30 = vector.load %arg3[%c2_20, %c0_21] : memref<6x128xf32, #tpu.memory_space<vmem>>, vector<1x128xf32>
    %31 = vector.broadcast %30 : vector<1x128xf32> to vector<32x128xf32>
    %32 = arith.addf %29, %31 : vector<32x128xf32>
    %c0_22 = arith.constant 0 : index
    %c0_23 = arith.constant 0 : index
    %33 = vector.load %arg5[%c0_22, %c0_23] : memref<32x128xf32, #tpu.memory_space<vmem>>, vector<32x128xf32>
    tpu.vector_store %arg5[%c0_22, %c0_23], %32 {strides = array<i32>} : memref<32x128xf32, #tpu.memory_space<vmem>>, vector<32x128xf32>,
    %34 = arith.truncf %32 : vector<32x128xf32> to vector<32x128xbf16>
    %c3 = arith.constant 3 : index
    %c0_24 = arith.constant 0 : index
    %c0_25 = arith.constant 0 : index
    %35 = vector.load %arg2[%c3, %c0_24, %c0_25] : memref<6x128x128xbf16, #tpu.memory_space<vmem>>, vector<1x128x128xbf16>
    %36 = vector.shape_cast %35 : vector<1x128x128xbf16> to vector<128x128xbf16>
    %cst_26 = arith.constant dense<0.000000e+00> : vector<32x128xf32>
    %37 = tpu.matmul %34, %36, %cst_26 {dimension_numbers = #tpu.dot_dimension_numbers<[1], [0], [0], [1], [0, 0, 1, 1], [], []>} : vector<32x128xbf16>, vector<128x128xbf16>, vector<32x128xf32> -> vector<32x128xf32>
    %c3_27 = arith.constant 3 : index
    %c0_28 = arith.constant 0 : index
    %38 = vector.load %arg3[%c3_27, %c0_28] : memref<6x128xf32, #tpu.memory_space<vmem>>, vector<1x128xf32>
    %39 = vector.broadcast %38 : vector<1x128xf32> to vector<32x128xf32>
    %40 = arith.addf %37, %39 : vector<32x128xf32>
    %cst_29 = arith.constant 0.000000e+00 : f32
    %41 = vector.broadcast %cst_29 : f32 to vector<32x128xf32>
    %42 = arith.cmpf ogt, %40, %41 : vector<32x128xf32>
    %cst_30 = arith.constant 1.000000e-01 : f32
    %43 = vector.broadcast %cst_30 : f32 to vector<32x128xf32>
    %44 = arith.mulf %43, %40 : vector<32x128xf32>
    %45 = arith.select %42, %40, %44 : vector<32x128xi1>, vector<32x128xf32>
    %46 = arith.truncf %45 : vector<32x128xf32> to vector<32x128xbf16>
    %c4 = arith.constant 4 : index
    %c0_31 = arith.constant 0 : index
    %c0_32 = arith.constant 0 : index
    %47 = vector.load %arg2[%c4, %c0_31, %c0_32] : memref<6x128x128xbf16, #tpu.memory_space<vmem>>, vector<1x128x128xbf16>
    %48 = vector.shape_cast %47 : vector<1x128x128xbf16> to vector<128x128xbf16>
    %cst_33 = arith.constant dense<0.000000e+00> : vector<32x128xf32>
    %49 = tpu.matmul %46, %48, %cst_33 {dimension_numbers = #tpu.dot_dimension_numbers<[1], [0], [0], [1], [0, 0, 1, 1], [], []>} : vector<32x128xbf16>, vector<128x128xbf16>, vector<32x128xf32> -> vector<32x128xf32>
    %c4_34 = arith.constant 4 : index
    %c0_35 = arith.constant 0 : index
    %50 = vector.load %arg3[%c4_34, %c0_35] : memref<6x128xf32, #tpu.memory_space<vmem>>, vector<1x128xf32>
    %51 = vector.broadcast %50 : vector<1x128xf32> to vector<32x128xf32>
    %52 = arith.addf %49, %51 : vector<32x128xf32>
    %cst_36 = arith.constant 0.000000e+00 : f32
    %53 = vector.broadcast %cst_36 : f32 to vector<32x128xf32>
    %54 = arith.cmpf ogt, %52, %53 : vector<32x128xf32>
    %cst_37 = arith.constant 1.000000e-01 : f32
    %55 = vector.broadcast %cst_37 : f32 to vector<32x128xf32>
    %56 = arith.mulf %55, %52 : vector<32x128xf32>
    %57 = arith.select %54, %52, %56 : vector<32x128xi1>, vector<32x128xf32>
    %58 = arith.truncf %57 : vector<32x128xf32> to vector<32x128xbf16>
    %c5 = arith.constant 5 : index
    %c0_38 = arith.constant 0 : index
    %c0_39 = arith.constant 0 : index
    %59 = vector.load %arg2[%c5, %c0_38, %c0_39] : memref<6x128x128xbf16, #tpu.memory_space<vmem>>, vector<1x128x128xbf16>
    %60 = vector.shape_cast %59 : vector<1x128x128xbf16> to vector<128x128xbf16>
    %cst_40 = arith.constant dense<0.000000e+00> : vector<32x128xf32>
    %61 = tpu.matmul %58, %60, %cst_40 {dimension_numbers = #tpu.dot_dimension_numbers<[1], [0], [0], [1], [0, 0, 1, 1], [], []>} : vector<32x128xbf16>, vector<128x128xbf16>, vector<32x128xf32> -> vector<32x128xf32>
    %c5_41 = arith.constant 5 : index
    %c0_42 = arith.constant 0 : index
    %62 = vector.load %arg3[%c5_41, %c0_42] : memref<6x128xf32, #tpu.memory_space<vmem>>, vector<1x128xf32>
    %63 = vector.broadcast %62 : vector<1x128xf32> to vector<32x128xf32>
    %64 = arith.addf %61, %63 : vector<32x128xf32>
    %65 = math.tanh %64 : vector<32x128xf32>
    %c0_43 = arith.constant 0 : index
    %c0_44 = arith.constant 0 : index
    %66 = vector.load %arg4[%c0_43, %c0_44] : memref<32x128xf32, #tpu.memory_space<vmem>>, vector<32x128xf32>
    tpu.vector_store %arg4[%c0_43, %c0_44], %65 {strides = array<i32>} : memref<32x128xf32, #tpu.memory_space<vmem>>, vector<32x128xf32>,
    %67 = vector.broadcast %1 : vector<1x128xf32> to vector<32x128xf32>
    %68 = arith.mulf %65, %67 : vector<32x128xf32>
    %cst_45 = arith.constant dense<0.000000e+00> : vector<32xf32>
    %69 = vector.multi_reduction <add>, %68, %cst_45 [1] : vector<32x128xf32> to vector<32xf32>
    %70 = vector.shape_cast %69 : vector<32xf32> to vector<32x1xf32>
    %71 = arith.mulf %65, %65 : vector<32x128xf32>
    %cst_46 = arith.constant dense<0.000000e+00> : vector<32xf32>
    %72 = vector.multi_reduction <add>, %71, %cst_46 [1] : vector<32x128xf32> to vector<32xf32>
    %73 = vector.shape_cast %72 : vector<32xf32> to vector<32x1xf32>
    %74 = math.sqrt %73 : vector<32x1xf32>
    %75 = arith.mulf %1, %1 : vector<1x128xf32>
    %76 = vector.shape_cast %75 : vector<1x128xf32> to vector<1x1x128xf32>
    %cst_47 = arith.constant dense<0.000000e+00> : vector<1xf32>
    %77 = vector.multi_reduction <add>, %76, %cst_47 [1, 2] : vector<1x1x128xf32> to vector<1xf32>
    %78 = vector.shape_cast %77 : vector<1xf32> to vector<1x1x1xf32>
    %79 = vector.extract %78[0, 0, 0] : f32 from vector<1x1x1xf32>
    %80 = vector.broadcast %79 : f32 to vector<1x1xf32>
    %81 = math.sqrt %80 : vector<1x1xf32>
    %82 = vector.broadcast %81 : vector<1x1xf32> to vector<32x1xf32>
    %83 = arith.mulf %74, %82 : vector<32x1xf32>
    %cst_48 = arith.constant 9.99999974E-6 : f32
    %84 = vector.broadcast %cst_48 : f32 to vector<32x1xf32>
    %85 = arith.addf %83, %84 : vector<32x1xf32>
    %86 = arith.divf %70, %85 : vector<32x1xf32>
    %87 = vector.shape_cast %86 : vector<32x1xf32> to vector<32x1xf32>
    %88 = vector.broadcast %87 : vector<32x1xf32> to vector<32x128xf32>
    %89 = tpu.transpose %88, [1, 0] : vector<32x128xf32> -> vector<128x32xf32>
    %90 = vector.extract_strided_slice %89 {offsets = [0, 0], sizes = [1, 32], strides = [1, 1]} : vector<128x32xf32> to vector<1x32xf32>
    %91 = tpu.iota {dimensions = array<i32: 0>} : vector<32x32xi32>
    %92 = tpu.iota {dimensions = array<i32: 1>} : vector<32x32xi32>
    %93 = vector.broadcast %90 : vector<1x32xf32> to vector<32x32xf32>
    %94 = vector.broadcast %86 : vector<32x1xf32> to vector<32x32xf32>
    %95 = arith.cmpf ogt, %93, %94 : vector<32x32xf32>
    %96 = vector.broadcast %90 : vector<1x32xf32> to vector<32x32xf32>
    %97 = vector.broadcast %86 : vector<32x1xf32> to vector<32x32xf32>
    %98 = arith.cmpf oeq, %96, %97 : vector<32x32xf32>
    %99 = arith.cmpi slt, %92, %91 : vector<32x32xi32>
    %100 = arith.andi %98, %99 : vector<32x32xi1>
    %101 = arith.ori %95, %100 : vector<32x32xi1>
    %102 = arith.extui %101 : vector<32x32xi1> to vector<32x32xi32>
    %103 = arith.sitofp %102 : vector<32x32xi32> to vector<32x32xf32>
    %cst_49 = arith.constant dense<0.000000e+00> : vector<32xf32>
    %104 = vector.multi_reduction <add>, %103, %cst_49 [1] : vector<32x32xf32> to vector<32xf32>
    %105 = vector.shape_cast %104 : vector<32xf32> to vector<32x1xf32>
    %cst_50 = arith.constant 2.000000e+01 : f32
    %106 = vector.broadcast %cst_50 : f32 to vector<32x1xf32>
    %107 = arith.cmpf olt, %105, %106 : vector<32x1xf32>
    %cst_51 = arith.constant 0.000000e+00 : f32
    %108 = vector.broadcast %cst_51 : f32 to vector<32x1xf32>
    %109 = arith.select %107, %86, %108 : vector<32x1xi1>, vector<32x1xf32>
    %110 = vector.shape_cast %109 : vector<32x1xf32> to vector<1x32x1xf32>
    %cst_52 = arith.constant dense<0.000000e+00> : vector<1xf32>
    %111 = vector.multi_reduction <add>, %110, %cst_52 [1, 2] : vector<1x32x1xf32> to vector<1xf32>
    %112 = vector.shape_cast %111 : vector<1xf32> to vector<1x1x1xf32>
    %113 = vector.extract %112[0, 0, 0] : f32 from vector<1x1x1xf32>
    %114 = vector.broadcast %113 : f32 to vector<1x1xf32>
    %115 = arith.subf %65, %0 : vector<32x128xf32>
    %116 = arith.mulf %115, %115 : vector<32x128xf32>
    %117 = vector.shape_cast %116 : vector<32x128xf32> to vector<1x32x128xf32>
    %cst_53 = arith.constant dense<0.000000e+00> : vector<1xf32>
    %118 = vector.multi_reduction <add>, %117, %cst_53 [1, 2] : vector<1x32x128xf32> to vector<1xf32>
    %119 = vector.shape_cast %118 : vector<1xf32> to vector<1x1x1xf32>
    %120 = vector.extract %119[0, 0, 0] : f32 from vector<1x1x1xf32>
    %121 = vector.broadcast %120 : f32 to vector<1x1xf32>
    %cst_54 = arith.constant 4.8828125E-4 : f32
    %122 = vector.broadcast %cst_54 : f32 to vector<1x1xf32>
    %123 = arith.mulf %121, %122 : vector<1x1xf32>
    %cst_55 = arith.constant 1.000000e-01 : f32
    %124 = vector.broadcast %cst_55 : f32 to vector<1x1xf32>
    %125 = arith.mulf %124, %114 : vector<1x1xf32>
    %126 = arith.addf %123, %125 : vector<1x1xf32>
    %c0_56 = arith.constant 0 : index
    %c0_57 = arith.constant 0 : index
    %127 = vector.load %arg6[%c0_56, %c0_57] : memref<1x1xf32, #tpu.memory_space<vmem>>, vector<1x1xf32>
    tpu.vector_store %arg6[%c0_56, %c0_57], %126 {strides = array<i32>} : memref<1x1xf32, #tpu.memory_space<vmem>>, vector<1x1xf32>,
    return
  }
}

</mosaic_0001>

<bundles_post_ra>
// kernel: ae_forward.1
= control target key start
LH: loop header
LB: loop body
LE: loop exit
PB: predicated region body
PF: predicated region fallthrough
CT: control target
= control target key end

     0   :  { %12 = vsyncpa [#allocation3], 0  ;;  %s1650_s0 = inlined_call_operand.vmem [shape: f32[32,128], index: 0, kind: input, shape index: {}]   ;;  %s1651_s1 = inlined_call_operand.vmem [shape: f32[1,128], index: 1, kind: input, shape index: {}]   ;;  %s1652_s2 = inlined_call_operand.hbm [shape: bf16[6,128,128], index: 2, kind: input, shape index: {}]   ;;  %s1653_s3 = inlined_call_operand.vmem [shape: f32[6,128], index: 3, kind: input, shape index: {}]   ;;  %s1654_s4 = inlined_call_operand.hbm [shape: f32[32,128], index: 4, kind: output, shape index: {0}]   ;;  %s1655_s5 = inlined_call_operand.vmem [shape: f32[32,128], index: 5, kind: output, shape index: {1}]   ;;  %s1656_s6 = inlined_call_operand.hbm [shape: f32[1,1], index: 6, kind: output, shape index: {2}]  }
   0x1   :  { %13 = vsyncpa [#allocation4], 0 }
   0x2   :  { %14 = vsyncpa [#allocation7], 0  ;;  %s1490_s21 = smov [#allocation2]   ;;  %s1418_s25 = scalar_lea.hbm %s1652_s2, 6144 }
   0x3   :  { %s24_s22 = sshll.u32 %s1490_s21, 4  ;;  %p1419_p0 = scmp.ne.s32.totalorder %s1652_s2, %s1418_s25  ;;  %s25_s22 = int_to_ptr.vmem [resolvable:$true] %s24_s22 }
   0x4   :  { %p1422_p1 = scmp.lt.u32.totalorder %s1418_s25, %s1652_s2 }
   0x6   :  { %p1424_p2 = pnand %p1422_p1, %p1419_p0 }
   0x8   :  { %1427 = shalt.err (!%p1424_p2)
}
   0x9   :  { %s1428_s30 = scalar_lea.vmem %s25_s22, 6144  ;;  %p1433_p4 = scmp.lt.s32.totalorder %s25_s22, %s25_s22 }
   0xa   :  { %p1429_p3 = scmp.ne.s32.totalorder %s25_s22, %s1428_s30  ;;  %p1434_p5 = scmp.lt.s32.totalorder %s1428_s30, %s1428_s30 }
   0xc   :  { %p1435_p6 = por %p1434_p5, %p1433_p4 }
   0xe   :  { %p1436_p7 = pnand %p1435_p6, %p1429_p3 }
  0x10   :  { %1439 = shalt.err (!%p1436_p7)
}
  0x11   :  { %s1491_s7 = smov 64   ;;  %s1492_s8 = smov 4  }
  0x12   :  { %30 = dma.hbm_to_vmem [thread:$0]  %s1652_s2, 6144, %s25_s22, [#allocation3], %s1491_s7, %s1491_s7, %s1492_s8  }
  0x13   :  { %1484 = dma.done.wait [#allocation3], 6144  }
  0x14   :  { %1485 = vsyncadd [#allocation3], 4294961152  ;;  %v1344_v0 = vld [vmem:[#allocation2] sm:$0xff]   ;;  %v1345_v1 = vld [vmem:[#allocation2 + $0x8] sm:$0xff]   ;;  %vm886_vm12 = vcmask 1040384   ;;  %s1494_s13 = smov [#allocation5]  }
  0x15   :  { %1210 = vmatprep.subr.bf16.mxu0 %v1344_v0  ;;  %v1346_v2 = vld [vmem:[#allocation2 + $0x10] sm:$0xff]   ;;  %v1347_v3 = vld [vmem:[#allocation2 + $0x18] sm:$0xff]   ;;  %v1548_v4 = vld [vmem:[%s1650_s0] sm:$0xff]  ;;  %s1062_s14 = sshll.u32 %s1494_s13, 4  ;;  %s1063_s14 = int_to_ptr.vmem [resolvable:$true] %s1062_s14 }
  0x16   :  { %1211 = vmatpush3.bf16.msra.mxu0 %v1344_v0  ;;  %v1553_v5 = vld [vmem:[%s1650_s0 + $0x8] sm:$0xff]  ;;  %v1352_v7 = vld [vmem:[#allocation2 + $0x40] sm:$0xff]   ;;  %v1354_v11 = vld [vmem:[#allocation2 + $0x50] sm:$0xff]   ;;  %s1440_s2 = scalar_lea.vmem %s1063_s14, 512  ;;  %p1445_p9 = scmp.lt.s32.totalorder %s1063_s14, %s1063_s14 }
  0x17   :  { %1212 = vmatprep.subr.bf16.mxu0 %v1345_v1  ;;  %v42_v6 = vpack.c.bf16 %v1553_v5, %v1548_v4  ;;  %v1353_v8 = vld [vmem:[#allocation2 + $0x48] sm:$0xff]   ;;  %v1348_v9 = vld [vmem:[#allocation2 + $0x20] sm:$0xff]   ;;  %1230 = vmatprep.subr.bf16.mxu1 %v1352_v7  ;;  %v1355_v12 = vld [vmem:[#allocation2 + $0x58] sm:$0xff]   ;;  %p1441_p8 = scmp.ne.s32.totalorder %s1063_s14, %s1440_s2  ;;  %p1446_p10 = scmp.lt.s32.totalorder %s1440_s2, %s1440_s2 }
  0x18   :  { %1231 = vmatpush3.bf16.msra.mxu1 %v1352_v7  ;;  %v1349_v10 = vld [vmem:[#allocation2 + $0x28] sm:$0xff]   ;;  %v1350_v13 = vld [vmem:[#allocation2 + $0x30] sm:$0xff]   ;;  %v1356_v14 = vld [vmem:[#allocation2 + $0x60] sm:$0xff]  }
  0x19   :  { %1226 = vmatprep.mubr.bf16.mxu0 %v42_v6  ;;  %1232 = vmatprep.subr.bf16.mxu1 %v1353_v8  ;;  %v1351_v15 = vld [vmem:[#allocation2 + $0x38] sm:$0xff]   ;;  %v1560_v16 = vld [vmem:[%s1650_s0 + $0x10] sm:$0xff]  ;;  %v1357_v19 = vld [vmem:[#allocation2 + $0x68] sm:$0xff]   ;;  %p1447_p11 = por %p1446_p10, %p1445_p9 }
  0x1a   :  { %1213 = vmatpush3.bf16.msra.mxu0 %v1345_v1  ;;  %v1565_v17 = vld [vmem:[%s1650_s0 + $0x18] sm:$0xff]  ;;  %v1358_v20 = vld [vmem:[#allocation2 + $0x70] sm:$0xff]   ;;  %v1360_v22 = vld [vmem:[#allocation2 + $0x80] sm:$0xff]  }
  0x1b   :  { %1214 = vmatprep.subr.bf16.mxu0 %v1346_v2  ;;  %v43_v18 = vpack.c.bf16 %v1565_v17, %v1560_v16  ;;  %v1359_v21 = vld [vmem:[#allocation2 + $0x78] sm:$0xff]   ;;  %v1361_v23 = vld [vmem:[#allocation2 + $0x88] sm:$0xff]   ;;  %v1362_v24 = vld [vmem:[#allocation2 + $0x90] sm:$0xff]   ;;  %p1448_p12 = pnand %p1447_p11, %p1441_p8 }
  0x1c   :  { %1233 = vmatpush3.bf16.msra.mxu1 %v1353_v8  ;;  %v1363_v25 = vld [vmem:[#allocation2 + $0x98] sm:$0xff]   ;;  %v1364_v26 = vld [vmem:[#allocation2 + $0xa0] sm:$0xff]   ;;  %v1365_v46 = vld [vmem:[#allocation2 + $0xa8] sm:$0xff]  }
  0x1d   :  { %1234 = vmatprep.subr.bf16.mxu1 %v1354_v11  ;;  %v1092_v27 = vld [vmem:[%s1653_s3] ss:$0 sm:$0xff]  ;;  %v1366_v47 = vld [vmem:[#allocation2 + $0xb0] sm:$0xff]   ;;  %v1367_v48 = vld [vmem:[#allocation2 + $0xb8] sm:$0xff]  }
  0x1e   :  { %1215 = vmatpush3.bf16.msra.mxu0 %v1346_v2  ;;  %v1368_v49 = vld [vmem:[#allocation2 + $0xc0] sm:$0xff]   ;;  %v1369_v50 = vld [vmem:[#allocation2 + $0xc8] sm:$0xff]   ;;  %v1370_v51 = vld [vmem:[#allocation2 + $0xd0] sm:$0xff]  }
  0x1f   :  { %1216 = vmatprep.subr.bf16.mxu0 %v1347_v3  ;;  %v1371_v52 = vld [vmem:[#allocation2 + $0xd8] sm:$0xff]   ;;  %v1372_v53 = vld [vmem:[#allocation2 + $0xe0] sm:$0xff]   ;;  %v1373_v54 = vld [vmem:[#allocation2 + $0xe8] sm:$0xff]  }
  0x20   :  { %1235 = vmatpush3.bf16.msra.mxu1 %v1354_v11  ;;  %v1101_v55 = vld [vmem:[%s1653_s3 + $0x1] ss:$0 sm:$0xff] }
  0x21   :  { %1236 = vmatprep.subr.bf16.mxu1 %v1355_v12 }
  0x22   :  { %1217 = vmatpush3.bf16.msra.mxu0 %v1347_v3 }
  0x23   :  { %1218 = vmatprep.subr.bf16.mxu0 %v1348_v9 }
  0x24   :  { %1237 = vmatpush3.bf16.msra.mxu1 %v1355_v12  ;;  %v1374_v12 = vld [vmem:[#allocation2 + $0xf0] sm:$0xff]  }
  0x25   :  { %1238 = vmatprep.subr.bf16.mxu1 %v1356_v14 }
  0x26   :  { %1219 = vmatpush3.bf16.msra.mxu0 %v1348_v9 }
  0x27   :  { %1220 = vmatprep.subr.bf16.mxu0 %v1349_v10 }
  0x28   :  { %1239 = vmatpush3.bf16.msra.mxu1 %v1356_v14  ;;  %v1376_v14 = vld [vmem:[#allocation2 + $0x100] sm:$0xff]  }
  0x29   :  { %1240 = vmatprep.subr.bf16.mxu1 %v1357_v19 }
  0x2a   :  { %1221 = vmatpush3.bf16.msra.mxu0 %v1349_v10 }
  0x2b   :  { %1222 = vmatprep.subr.bf16.mxu0 %v1350_v13 }
  0x2c   :  { %1241 = vmatpush3.bf16.msra.mxu1 %v1357_v19  ;;  %v1379_v19 = vld [vmem:[#allocation2 + $0x118] sm:$0xff]  }
  0x2d   :  { %1242 = vmatprep.subr.bf16.mxu1 %v1358_v20 }
  0x2e   :  { %1223 = vmatpush3.bf16.msra.mxu0 %v1350_v13  ;;  %v1375_v13 = vld [vmem:[#allocation2 + $0xf8] sm:$0xff]  }
  0x2f   :  { %1224 = vmatprep.subr.bf16.mxu0 %v1351_v15 }
  0x30   :  { %1243 = vmatpush3.bf16.msra.mxu1 %v1358_v20  ;;  %v1380_v20 = vld [vmem:[#allocation2 + $0x120] sm:$0xff]  }
  0x31   :  { %1244 = vmatprep.subr.bf16.mxu1 %v1359_v21 }
  0x32   :  { %1225 = vmatpush3.bf16.msra.mxu0 %v1351_v15  ;;  %v1377_v15 = vld [vmem:[#allocation2 + $0x108] sm:$0xff]  }
  0x33   :  { %1250 = vmatprep.subr.bf16.mxu0 %v1360_v22 }
  0x34   :  { %1245 = vmatpush3.bf16.msra.mxu1 %v1359_v21  ;;  %v1110_v21 = vld [vmem:[%s1653_s3 + $0x2] ss:$0 sm:$0xff] }
  0x35   :  { %1227 = vmatmul.mubr.bf16.vlgmr.msra.gmra.mrb[0].mxu0 %v43_v18  ;;  %1270 = vmatprep.subr.bf16.mxu1 %v1368_v49  ;;  %v1378_v18 = vld [vmem:[#allocation2 + $0x110] sm:$0xff]  }
  0x36   :  { %1251 = vmatpush3.bf16.msra.mxu0 %v1360_v22 }
  0x37   :  { %1252 = vmatprep.subr.bf16.mxu0 %v1361_v23 }
  0x3a   :  { %1253 = vmatpush3.bf16.msra.mxu0 %v1361_v23 }
  0x3b   :  { %1254 = vmatprep.subr.bf16.mxu0 %v1362_v24 }
  0x3e   :  { %1255 = vmatpush3.bf16.msra.mxu0 %v1362_v24 }
  0x3f   :  { %1256 = vmatprep.subr.bf16.mxu0 %v1363_v25 }
  0x42   :  { %1257 = vmatpush3.bf16.msra.mxu0 %v1363_v25 }
  0x43   :  { %1258 = vmatprep.subr.bf16.mxu0 %v1364_v26 }
  0x46   :  { %1259 = vmatpush3.bf16.msra.mxu0 %v1364_v26 }
  0x47   :  { %1260 = vmatprep.subr.bf16.mxu0 %v1365_v46 }
  0x4a   :  { %1261 = vmatpush3.bf16.msra.mxu0 %v1365_v46 }
  0x4b   :  { %1262 = vmatprep.subr.bf16.mxu0 %v1366_v47 }
  0x4e   :  { %1263 = vmatpush3.bf16.msra.mxu0 %v1366_v47 }
  0x4f   :  { %1264 = vmatprep.subr.bf16.mxu0 %v1367_v48 }
  0x52   :  { %1265 = vmatpush3.bf16.msra.mxu0 %v1367_v48 }
  0x53   :  { %1290 = vmatprep.subr.bf16.mxu0 %v1376_v14 }
 0x108   :  { %v1228_v28 = vpop.f32.mrb[0].mxu0 }
 0x109   :  { %v156_v29 = vadd.f32 %v1228_v28, %v1092_v27  ;;  %v147_v30 = vpop.f32.mrb[1].mxu0 }
 0x10a   :  { %v148_v31 = vadd.f32 %v1092_v27, %v147_v30  ;;  %v1229_v32 = vpop.f32.mrb[2].mxu0 }
 0x10b   :  { %v168_v33 = vmul.f32 0.1, %v156_v29  ;;  %v159_v34 = vadd.f32 %v1229_v32, %v1092_v27  ;;  %v150_v35 = vpop.f32.mrb[3].mxu0  ;;  %vm164_vm0 = vcmp.gt.f32.partialorder %v156_v29, 0.0  ;;  %v1381_v32 = vld [vmem:[#allocation2 + $0x128] sm:$0xff]  }
 0x10c   :  { %v166_v36 = vmul.f32 0.1, %v148_v31  ;;  %v151_v37 = vadd.f32 %v1092_v27, %v150_v35  ;;  %vm162_vm2 = vcmp.gt.f32.partialorder %v148_v31, 0.0  ;;  %v1384_v35 = vld [vmem:[#allocation2 + $0x140] sm:$0xff]  }
 0x10d   :  { %vm165_vm1 = vcmp.gt.f32.partialorder %v159_v34, 0.0  ;;  %v169_v38 = vmul.f32 0.1, %v159_v34  ;;  %v172_v40 = vsel %vm164_vm0, %v156_v29, %v168_v33  ;;  %v1382_v33 = vld [vmem:[#allocation2 + $0x130] sm:$0xff]  }
 0x10e   :  { %v167_v39 = vmul.f32 0.1, %v151_v37  ;;  %vm163_vm3 = vcmp.gt.f32.partialorder %v151_v37, 0.0  ;;  %v170_v42 = vsel %vm162_vm2, %v148_v31, %v166_v36  ;;  %v1385_v36 = vld [vmem:[#allocation2 + $0x148] sm:$0xff]  }
 0x10f   :  { %v173_v41 = vsel %vm165_vm1, %v159_v34, %v169_v38  ;;  %v1383_v34 = vld [vmem:[#allocation2 + $0x138] sm:$0xff]  }
 0x110   :  { %v171_v43 = vsel %vm163_vm3, %v151_v37, %v167_v39  ;;  %v175_v44 = vpack.c.bf16 %v173_v41, %v172_v40  ;;  %v1386_v37 = vld [vmem:[#allocation2 + $0x150] sm:$0xff]   ;;  %v1387_v38 = vld [vmem:[#allocation2 + $0x158] sm:$0xff]   ;;  %v1388_v39 = vld [vmem:[#allocation2 + $0x160] sm:$0xff]  }
 0x111   :  { %v174_v45 = vpack.c.bf16 %v171_v43, %v170_v42  ;;  %v1119_v40 = vld [vmem:[%s1653_s3 + $0x3] ss:$0 sm:$0xff] }
 0x113   :  { %1246 = vmatprep.mubr.bf16.mxu1 %v174_v45 }
 0x114   :  { %1247 = vmatmul.mubr.bf16.vlgmr.msra.gmra.mrb[0].mxu1 %v175_v44 }
 0x115   :  { %1271 = vmatpush3.bf16.msra.mxu1 %v1368_v49 }
 0x116   :  { %1272 = vmatprep.subr.bf16.mxu1 %v1369_v50 }
 0x119   :  { %1273 = vmatpush3.bf16.msra.mxu1 %v1369_v50 }
 0x11a   :  { %1274 = vmatprep.subr.bf16.mxu1 %v1370_v51 }
 0x11d   :  { %1275 = vmatpush3.bf16.msra.mxu1 %v1370_v51 }
 0x11e   :  { %1276 = vmatprep.subr.bf16.mxu1 %v1371_v52 }
 0x121   :  { %1277 = vmatpush3.bf16.msra.mxu1 %v1371_v52 }
 0x122   :  { %1278 = vmatprep.subr.bf16.mxu1 %v1372_v53 }
 0x125   :  { %1279 = vmatpush3.bf16.msra.mxu1 %v1372_v53 }
 0x126   :  { %1280 = vmatprep.subr.bf16.mxu1 %v1373_v54 }
 0x129   :  { %1281 = vmatpush3.bf16.msra.mxu1 %v1373_v54 }
 0x12a   :  { %1282 = vmatprep.subr.bf16.mxu1 %v1374_v12 }
 0x12d   :  { %1283 = vmatpush3.bf16.msra.mxu1 %v1374_v12 }
 0x12e   :  { %1284 = vmatprep.subr.bf16.mxu1 %v1375_v13 }
 0x131   :  { %1285 = vmatpush3.bf16.msra.mxu1 %v1375_v13 }
 0x132   :  { %1310 = vmatprep.subr.bf16.mxu1 %v1384_v35 }
 0x1e7   :  { %v1248_v56 = vpop.f32.mrb[0].mxu1 }
 0x1e8   :  { %v289_v57 = vadd.f32 %v1248_v56, %v1101_v55  ;;  %v280_v58 = vpop.f32.mrb[1].mxu1 }
 0x1e9   :  { %v281_v59 = vadd.f32 %v1101_v55, %v280_v58  ;;  %v1249_v60 = vpop.f32.mrb[2].mxu1 }
 0x1ea   :  { %v301_v61 = vmul.f32 0.1, %v289_v57  ;;  %v292_v62 = vadd.f32 %v1249_v60, %v1101_v55  ;;  %v283_v63 = vpop.f32.mrb[3].mxu1  ;;  %vm297_vm4 = vcmp.gt.f32.partialorder %v289_v57, 0.0  ;;  %v1390_v60 = vld [vmem:[#allocation2 + $0x170] sm:$0xff]  }
 0x1eb   :  { %v299_v0 = vmul.f32 0.1, %v281_v59  ;;  %v284_v1 = vadd.f32 %v1101_v55, %v283_v63  ;;  %vm295_vm5 = vcmp.gt.f32.partialorder %v281_v59, 0.0 }
 0x1ec   :  { %vm298_vm6 = vcmp.gt.f32.partialorder %v292_v62, 0.0  ;;  %v302_v2 = vmul.f32 0.1, %v292_v62  ;;  %v305_v6 = vsel %vm297_vm4, %v289_v57, %v301_v61  ;;  %v1391_v61 = vld [vmem:[#allocation2 + $0x178] sm:$0xff]  }
 0x1ed   :  { %vm296_vm7 = vcmp.gt.f32.partialorder %v284_v1, 0.0  ;;  %v300_v3 = vmul.f32 0.1, %v284_v1  ;;  %v303_v9 = vsel %vm295_vm5, %v281_v59, %v299_v0  ;;  %v1389_v59 = vld [vmem:[#allocation2 + $0x168] sm:$0xff]  }
 0x1ee   :  { %v306_v7 = vsel %vm298_vm6, %v292_v62, %v302_v2  ;;  %v41_v62 = vld [vmem:[%s1651_s1] sm:$0x1] }
 0x1ef   :  { %v308_v8 = vpack.c.bf16 %v306_v7, %v305_v6  ;;  %v304_v10 = vsel %vm296_vm7, %v284_v1, %v300_v3  ;;  %v885_v63 = vmul.f32 %v41_v62, %v41_v62  ;;  %v1128_v1 = vld [vmem:[%s1653_s3 + $0x4] ss:$0 sm:$0xff] }
 0x1f0   :  { %v307_v11 = vpack.c.bf16 %v304_v10, %v303_v9 }
 0x1f1   :  { %v887_v0 = vsel %vm886_vm12, %v885_v63, 0.0 }
 0x1f2   :  { %1266 = vmatprep.mubr.bf16.mxu0 %v307_v11  ;;  %888 = vadd.xlane.f32.xlu0 %v887_v0 }
 0x1f3   :  { %1267 = vmatmul.mubr.bf16.vlgmr.msra.gmra.mrb[4].mxu0 %v308_v8 }
 0x1f4   :  { %1291 = vmatpush3.bf16.msra.mxu0 %v1376_v14 }
 0x1f5   :  { %1292 = vmatprep.subr.bf16.mxu0 %v1377_v15 }
 0x1f8   :  { %1293 = vmatpush3.bf16.msra.mxu0 %v1377_v15 }
 0x1f9   :  { %1294 = vmatprep.subr.bf16.mxu0 %v1378_v18 }
 0x1fc   :  { %1295 = vmatpush3.bf16.msra.mxu0 %v1378_v18 }
 0x1fd   :  { %1296 = vmatprep.subr.bf16.mxu0 %v1379_v19 }
 0x200   :  { %1297 = vmatpush3.bf16.msra.mxu0 %v1379_v19 }
 0x201   :  { %1298 = vmatprep.subr.bf16.mxu0 %v1380_v20 }
 0x204   :  { %1299 = vmatpush3.bf16.msra.mxu0 %v1380_v20 }
 0x205   :  { %1300 = vmatprep.subr.bf16.mxu0 %v1381_v32 }
 0x208   :  { %1301 = vmatpush3.bf16.msra.mxu0 %v1381_v32  ;;  %v1137_v32 = vld [vmem:[%s1653_s3 + $0x5] ss:$0 sm:$0xff] }
 0x209   :  { %1302 = vmatprep.subr.bf16.mxu0 %v1382_v33 }
 0x20c   :  { %1303 = vmatpush3.bf16.msra.mxu0 %v1382_v33 }
 0x20d   :  { %1304 = vmatprep.subr.bf16.mxu0 %v1383_v34 }
 0x210   :  { %1305 = vmatpush3.bf16.msra.mxu0 %v1383_v34 }
 0x2c6   :  { %v1268_v22 = vpop.f32.mrb[4].mxu0 }
 0x2c7   :  { %v422_v23 = vadd.f32 %v1268_v22, %v1110_v21  ;;  %v413_v24 = vpop.f32.mrb[5].mxu0 }
 0x2c8   :  { %v414_v25 = vadd.f32 %v1110_v21, %v413_v24  ;;  %v1269_v26 = vpop.f32.mrb[6].mxu0  ;;  %v889_v24 = vpop.xlane.xlu0 %888 }
 0x2c9   :  { %430 = vst [vmem:[%s1655_s5 + $0x10] sm:$0xff] %v422_v23  ;;  %v425_v27 = vadd.f32 %v1269_v26, %v1110_v21  ;;  %v416_v28 = vpop.f32.mrb[7].mxu0 }
 0x2ca   :  { %428 = vst [vmem:[%s1655_s5] sm:$0xff] %v414_v25  ;;  %v417_v29 = vadd.f32 %v1110_v21, %v416_v28 }
 0x2cb   :  { %431 = vst [vmem:[%s1655_s5 + $0x18] sm:$0xff] %v425_v27  ;;  %v433_v30 = vpack.c.bf16 %v425_v27, %v422_v23 }
 0x2cc   :  { %429 = vst [vmem:[%s1655_s5 + $0x8] sm:$0xff] %v417_v29  ;;  %v432_v31 = vpack.c.bf16 %v417_v29, %v414_v25  ;;  %v890_v25 = vrot.slane %v889_v24, 4 }
 0x2ce   :  { %1286 = vmatprep.mubr.bf16.mxu1 %v432_v31  ;;  %v891_v26 = vadd.f32 %v890_v25, %v889_v24  ;;  %v828_v31 = vlaneseq }
 0x2cf   :  { %1287 = vmatmul.mubr.bf16.vlgmr.msra.gmra.mrb[4].mxu1 %v433_v30 }
 0x2d0   :  { %1311 = vmatpush3.bf16.msra.mxu1 %v1384_v35  ;;  %v892_v27 = vrot.slane %v891_v26, 2 }
 0x2d1   :  { %1312 = vmatprep.subr.bf16.mxu1 %v1385_v36 }
 0x2d2   :  { %v893_v28 = vadd.f32 %v892_v27, %v891_v26 }
 0x2d4   :  { %1313 = vmatpush3.bf16.msra.mxu1 %v1385_v36  ;;  %v894_v29 = vrot.slane %v893_v28, 1  ;;  %v1603_v36 = vshrl.u32 %v828_v31, 7 }
 0x2d5   :  { %1314 = vmatprep.subr.bf16.mxu1 %v1386_v37 }
 0x2d6   :  { %v895_v30 = vadd.f32 %v894_v29, %v893_v28 }
 0x2d8   :  { %1315 = vmatpush3.bf16.msra.mxu1 %v1386_v37  ;;  %1330 = vpush %v895_v30 }
 0x2d9   :  { %1316 = vmatprep.subr.bf16.mxu1 %v1387_v38 }
 0x2dc   :  { %1317 = vmatpush3.bf16.msra.mxu1 %v1387_v38 }
 0x2dd   :  { %1318 = vmatprep.subr.bf16.mxu1 %v1388_v39 }
 0x2e0   :  { %1319 = vmatpush3.bf16.msra.mxu1 %v1388_v39 }
 0x2e1   :  { %1320 = vmatprep.subr.bf16.mxu1 %v1389_v59 }
 0x2e4   :  { %1321 = vmatpush3.bf16.msra.mxu1 %v1389_v59 }
 0x2e5   :  { %1322 = vmatprep.subr.bf16.mxu1 %v1390_v60 }
 0x2e8   :  { %1323 = vmatpush3.bf16.msra.mxu1 %v1390_v60 }
 0x2e9   :  { %1324 = vmatprep.subr.bf16.mxu1 %v1391_v61 }
 0x2ec   :  { %1325 = vmatpush3.bf16.msra.mxu1 %v1391_v61 }
 0x309   :  { %s1331_s3 = spop %1330 }
 0x3a2   :  { %v1288_v41 = vpop.f32.mrb[4].mxu1 }
 0x3a3   :  { %v547_v42 = vadd.f32 %v1288_v41, %v1119_v40  ;;  %v538_v43 = vpop.f32.mrb[5].mxu1 }
 0x3a4   :  { %v539_v44 = vadd.f32 %v1119_v40, %v538_v43  ;;  %v1289_v45 = vpop.f32.mrb[6].mxu1 }
 0x3a5   :  { %v559_v46 = vmul.f32 0.1, %v547_v42  ;;  %v550_v47 = vadd.f32 %v1289_v45, %v1119_v40  ;;  %v541_v48 = vpop.f32.mrb[7].mxu1  ;;  %vm555_vm8 = vcmp.gt.f32.partialorder %v547_v42, 0.0 }
 0x3a6   :  { %v557_v49 = vmul.f32 0.1, %v539_v44  ;;  %v542_v50 = vadd.f32 %v1119_v40, %v541_v48  ;;  %vm553_vm9 = vcmp.gt.f32.partialorder %v539_v44, 0.0 }
 0x3a7   :  { %vm556_vm10 = vcmp.gt.f32.partialorder %v550_v47, 0.0  ;;  %v560_v51 = vmul.f32 0.1, %v550_v47  ;;  %v563_v53 = vsel %vm555_vm8, %v547_v42, %v559_v46  ;;  %v830_v42 = vsub.s32 0, %v1603_v36 }
 0x3a8   :  { %vm554_vm11 = vcmp.gt.f32.partialorder %v542_v50, 0.0  ;;  %v558_v52 = vmul.f32 0.1, %v542_v50  ;;  %v561_v56 = vsel %vm553_vm9, %v539_v44, %v557_v49 }
 0x3a9   :  { %v564_v54 = vsel %vm556_vm10, %v550_v47, %v560_v51  ;;  %v831_v43 = vrot.slane %v41_v62, %v830_v42 }
 0x3aa   :  { %v566_v55 = vpack.c.bf16 %v564_v54, %v563_v53  ;;  %v562_v57 = vsel %vm554_vm11, %v542_v50, %v558_v52 }
 0x3ab   :  { %v565_v58 = vpack.c.bf16 %v562_v57, %v561_v56 }
 0x3ad   :  { %1306 = vmatprep.mubr.bf16.mxu0 %v565_v58 }
 0x3ae   :  { %1307 = vmatmul.mubr.bf16.vlgmr.msra.gmra.mrb[8].mxu0 %v566_v55 }
 0x481   :  { %v1308_v2 = vpop.f32.mrb[8].mxu0 }
 0x482   :  { %v680_v3 = vadd.f32 %v1308_v2, %v1128_v1  ;;  %v671_v6 = vpop.f32.mrb[9].mxu0 }
 0x483   :  { %v672_v7 = vadd.f32 %v1128_v1, %v671_v6  ;;  %v1309_v8 = vpop.f32.mrb[10].mxu0 }
 0x484   :  { %v692_v9 = vmul.f32 0.1, %v680_v3  ;;  %v683_v10 = vadd.f32 %v1309_v8, %v1128_v1  ;;  %v674_v11 = vpop.f32.mrb[11].mxu0  ;;  %vm688_vm13 = vcmp.gt.f32.partialorder %v680_v3, 0.0 }
 0x485   :  { %v690_v12 = vmul.f32 0.1, %v672_v7  ;;  %v675_v13 = vadd.f32 %v1128_v1, %v674_v11  ;;  %vm686_vm14 = vcmp.gt.f32.partialorder %v672_v7, 0.0 }
 0x486   :  { %vm689_vm15 = vcmp.gt.f32.partialorder %v683_v10, 0.0  ;;  %v693_v14 = vmul.f32 0.1, %v683_v10  ;;  %v696_v18 = vsel %vm688_vm13, %v680_v3, %v692_v9 }
 0x487   :  { %vm687_vm0 = vcmp.gt.f32.partialorder %v675_v13, 0.0  ;;  %v691_v15 = vmul.f32 0.1, %v675_v13  ;;  %v694_v21 = vsel %vm686_vm14, %v672_v7, %v690_v12 }
 0x488   :  { %v697_v19 = vsel %vm689_vm15, %v683_v10, %v693_v14 }
 0x489   :  { %v699_v20 = vpack.c.bf16 %v697_v19, %v696_v18  ;;  %v695_v22 = vsel %vm687_vm0, %v675_v13, %v691_v15 }
 0x48a   :  { %v698_v23 = vpack.c.bf16 %v695_v22, %v694_v21 }
 0x48c   :  { %1326 = vmatprep.mubr.bf16.mxu1 %v698_v23 }
 0x48d   :  { %1327 = vmatmul.mubr.bf16.vlgmr.msra.gmra.mrb[8].mxu1 %v699_v20 }
 0x560   :  { %v1328_v33 = vpop.f32.mrb[8].mxu1 }
 0x561   :  { %v813_v34 = vadd.f32 %v1328_v33, %v1137_v32  ;;  %v804_v35 = vpop.f32.mrb[9].mxu1 }
 0x562   :  { %v805_v37 = vadd.f32 %v1137_v32, %v804_v35  ;;  %v1329_v38 = vpop.f32.mrb[10].mxu1 }
 0x563   :  { %1392 = vtanh.f32 %v813_v34  ;;  %v816_v39 = vadd.f32 %v1329_v38, %v1137_v32  ;;  %v807_v40 = vpop.f32.mrb[11].mxu1 }
 0x564   :  { %1394 = vtanh.f32 %v805_v37  ;;  %v808_v41 = vadd.f32 %v1137_v32, %v807_v40 }
 0x565   :  { %1396 = vtanh.f32 %v816_v39 }
 0x566   :  { %1398 = vtanh.f32 %v808_v41 }
 0x56d   :  { %v1393_v44 = vpop.eup %1392 }
 0x56e   :  { %v1395_v45 = vpop.eup %1394  ;;  %825 = vst [vmem:[#allocation5 + $0x10] sm:$0xff] %v1393_v44  ;;  %v835_v46 = vmul.f32 %v1393_v44, %v831_v43  ;;  %v1033_v56 = vsub.f32 %v1393_v44, %v1560_v16  ;;  %v847_v61 = vmul.f32 %v1393_v44, %v1393_v44 }
 0x56f   :  { %v1397_v47 = vpop.eup %1396  ;;  %823 = vst [vmem:[#allocation5] sm:$0xff] %v1395_v45  ;;  %v845_v48 = vmul.f32 %v1395_v45, %v1395_v45  ;;  %v833_v49 = vmul.f32 %v1395_v45, %v831_v43  ;;  %v1031_v50 = vsub.f32 %v1395_v45, %v1548_v4 }
 0x570   :  { %v1399_v51 = vpop.eup %1398  ;;  %826 = vst [vmem:[#allocation5 + $0x18] sm:$0xff] %v1397_v47  ;;  %v836_v52 = vmul.f32 %v1397_v47, %v831_v43  ;;  %v848_v57 = vmul.f32 %v1397_v47, %v1397_v47  ;;  %v1034_v58 = vsub.f32 %v1397_v47, %v1565_v17  ;;  %v1037_v4 = vmul.f32 %v1033_v56, %v1033_v56 }
 0x571   :  { %824 = vst [vmem:[#allocation5 + $0x8] sm:$0xff] %v1399_v51  ;;  %849 = vadd.xlane.f32.xlu0 %v845_v48  ;;  %v846_v53 = vmul.f32 %v1399_v51, %v1399_v51  ;;  %v834_v54 = vmul.f32 %v1399_v51, %v831_v43  ;;  %v1032_v55 = vsub.f32 %v1399_v51, %v1553_v5  ;;  %v897_v5 = vstv %s1331_s3 }
 0x572   :  { %v1035_v59 = vmul.f32 %v1031_v50, %v1031_v50  ;;  %v1038_v63 = vmul.f32 %v1034_v58, %v1034_v58  ;;  %1400 = vrsqrt.f32 %v897_v5  ;;  %vm900_vm1 = vcmp.eq.f32.partialorder %v897_v5, inf }
 0x573   :  { %851 = vadd.xlane.f32.xlu1 %v846_v53  ;;  %v1036_v60 = vmul.f32 %v1032_v55, %v1032_v55  ;;  %v903_v9 = vand.u32 2147483648, %v897_v5  ;;  %vm902_vm2 = vcmp.eq.f32.partialorder %v897_v5, 0.0  ;;  %v959_v56 = vand.u32 127, %v828_v31 }
 0x574   :  { %v1493_v31 = vmov 0.0  }
 0x575   :  { %855 = vadd.xlane.f32.xlu0 %v848_v57  ;;  %v1039_v62 = vadd.f32 %v1036_v60, %v1035_v59  ;;  %v955_v57 = vadd.s32 8, %v1603_v36  ;;  %vm972_vm11 = vcmp.lt.s32.totalorder %v959_v56, %v1603_v36  ;;  %v956_v60 = vadd.s32 16, %v1603_v36 }
 0x577   :  { %853 = vadd.xlane.f32.xlu1 %v847_v61  ;;  %v1040_v0 = vadd.f32 %v1039_v62, %v1037_v4  ;;  %vm973_vm12 = vcmp.lt.s32.totalorder %v959_v56, %v955_v57  ;;  %v957_v61 = vadd.s32 24, %v1603_v36 }
 0x579   :  { %839 = vadd.xlane.f32.xlu0 %v834_v54  ;;  %v1612_v1 = vadd.f32 %v1040_v0, %v1038_v63 }
 0x57b   :  { %837 = vadd.xlane.f32.xlu1 %v833_v49 }
 0x57c   :  { %v1401_v3 = vpop.eup %1400 }
 0x57d   :  { %843 = vadd.xlane.f32.xlu0 %v836_v52  ;;  %v899_v7 = vmul.f32 %v1401_v3, %v897_v5 }
 0x57f   :  { %841 = vadd.xlane.f32.xlu1 %v835_v46  ;;  %v901_v10 = vsel %vm900_vm1, %v897_v5, %v899_v7  ;;  %vm992_vm1 = vcmask 261120  }
 0x580   :  { %v904_v19 = vsel %vm902_vm2, %v903_v9, %v901_v10 }
 0x5fe   :  { %v850_v16 = vpop.xlane.xlu0 %849 }
 0x5ff   :  { %1402 = vrsqrt.f32 %v850_v16  ;;  %vm859_vm3 = vcmp.eq.f32.partialorder %v850_v16, inf  ;;  %v862_v13 = vand.u32 2147483648, %v850_v16  ;;  %vm861_vm4 = vcmp.eq.f32.partialorder %v850_v16, 0.0 }
 0x600   :  { %v852_v17 = vpop.xlane.xlu1 %851 }
 0x601   :  { %1404 = vrsqrt.f32 %v852_v17  ;;  %vm866_vm5 = vcmp.eq.f32.partialorder %v852_v17, inf  ;;  %v869_v20 = vand.u32 2147483648, %v852_v17  ;;  %vm868_vm6 = vcmp.eq.f32.partialorder %v852_v17, 0.0 }
 0x602   :  { %v856_v2 = vpop.xlane.xlu0 %855 }
 0x603   :  { %1406 = vrsqrt.f32 %v856_v2  ;;  %vm880_vm7 = vcmp.eq.f32.partialorder %v856_v2, inf  ;;  %vm882_vm8 = vcmp.eq.f32.partialorder %v856_v2, 0.0  ;;  %v883_v26 = vand.u32 2147483648, %v856_v2 }
 0x604   :  { %v854_v6 = vpop.xlane.xlu1 %853 }
 0x605   :  { %1408 = vrsqrt.f32 %v854_v6  ;;  %vm873_vm9 = vcmp.eq.f32.partialorder %v854_v6, inf  ;;  %v876_v33 = vand.u32 2147483648, %v854_v6  ;;  %vm875_vm10 = vcmp.eq.f32.partialorder %v854_v6, 0.0 }
 0x606   :  { %v840_v48 = vpop.xlane.xlu0 %839 }
 0x608   :  { %v838_v45 = vpop.xlane.xlu1 %837 }
 0x609   :  { %v1403_v8 = vpop.eup %1402 }
 0x60a   :  { %v858_v11 = vmul.f32 %v1403_v8, %v850_v16  ;;  %v844_v54 = vpop.xlane.xlu0 %843 }
 0x60b   :  { %v1405_v12 = vpop.eup %1404 }
 0x60c   :  { %v860_v14 = vsel %vm859_vm3, %v850_v16, %v858_v11  ;;  %v865_v15 = vmul.f32 %v1405_v12, %v852_v17  ;;  %v842_v51 = vpop.xlane.xlu1 %841 }
 0x60d   :  { %v1407_v18 = vpop.eup %1406  ;;  %v863_v21 = vsel %vm861_vm4, %v862_v13, %v860_v14 }
 0x60e   :  { %v867_v22 = vsel %vm866_vm5, %v852_v17, %v865_v15  ;;  %v879_v23 = vmul.f32 %v1407_v18, %v856_v2  ;;  %v905_v24 = vmul.f32 %v904_v19, %v863_v21  ;;  %vm974_vm5 = vcmp.lt.s32.totalorder %v959_v56, %v956_v60 }
 0x60f   :  { %v1409_v25 = vpop.eup %1408  ;;  %v870_v27 = vsel %vm868_vm6, %v869_v20, %v867_v22 }
 0x610   :  { %v881_v28 = vsel %vm880_vm7, %v856_v2, %v879_v23  ;;  %v872_v29 = vmul.f32 %v1409_v25, %v854_v6  ;;  %v906_v30 = vmul.f32 %v904_v19, %v870_v27  ;;  %v909_v32 = vadd.f32 1e-05, %v905_v24 }
 0x611   :  { %v884_v34 = vsel %vm882_vm8, %v883_v26, %v881_v28 }
 0x612   :  { %v874_v35 = vsel %vm873_vm9, %v854_v6, %v872_v29  ;;  %v910_v37 = vadd.f32 1e-05, %v906_v30  ;;  %1410 = vrcp.f32 %v909_v32  ;;  %v908_v39 = vmul.f32 %v904_v19, %v884_v34 }
 0x613   :  { %v877_v38 = vsel %vm875_vm10, %v876_v33, %v874_v35  ;;  %vm975_vm10 = vcmp.lt.s32.totalorder %v959_v56, %v957_v61 }
 0x614   :  { %1412 = vrcp.f32 %v910_v37  ;;  %v907_v40 = vmul.f32 %v904_v19, %v877_v38  ;;  %v912_v43 = vadd.f32 1e-05, %v908_v39 }
 0x616   :  { %v911_v41 = vadd.f32 1e-05, %v907_v40 }
 0x618   :  { %1414 = vrcp.f32 %v911_v41 }
 0x619   :  { %1416 = vrcp.f32 %v912_v43 }
 0x61c   :  { %v1411_v44 = vpop.eup %1410 }
 0x61d   :  { %v914_v46 = vmul.f32 %v1411_v44, %v838_v45 }
 0x61e   :  { %v1413_v47 = vpop.eup %1412 }
 0x61f   :  { %921 = vxpose.xlu1.b32.start [1/4] (short) (narrow) %v914_v46, 8  ;;  %v916_v49 = vmul.f32 %v1413_v47, %v840_v48 }
 0x622   :  { %v1415_v50 = vpop.eup %1414 }
 0x623   :  { %922 = vxpose.xlu1.b32.cont [2/4] (short) (narrow) %v916_v49, 8  ;;  %v918_v52 = vmul.f32 %v1415_v50, %v842_v51  ;;  %v1417_v53 = vpop.eup %1416 }
 0x624   :  { %v920_v55 = vmul.f32 %v1417_v53, %v844_v54 }
 0x627   :  { %923 = vxpose.xlu1.b32.cont [3/4] (short) (narrow) %v918_v52, 8 }
 0x62b   :  { %924 = vxpose.xlu1.b32.end [4/4] (short) (narrow) %v920_v55, 8 }
 0x69f   :  { %v937_v58 = vpop.trf.xlu1 }
 0x6a0   :  { %v963_v59 = vrot.slane %v937_v58, %v830_v42 }
 0x6a2   :  { %vm964_vm13 = vcmp.gt.f32.partialorder %v963_v59, %v914_v46  ;;  %vm968_vm14 = vcmp.eq.f32.partialorder %v963_v59, %v914_v46  ;;  %vm969_vm15 = vcmp.eq.f32.partialorder %v963_v59, %v916_v49  ;;  %vm965_vm2 = vcmp.gt.f32.partialorder %v963_v59, %v916_v49 }
 0x6a3   :  { %vm976_vm0 = vmand %vm968_vm14, %vm972_vm11  ;;  %vm970_vm4 = vcmp.eq.f32.partialorder %v963_v59, %v918_v52  ;;  %vm966_vm7 = vcmp.gt.f32.partialorder %v963_v59, %v918_v52  ;;  %vm971_vm9 = vcmp.eq.f32.partialorder %v963_v59, %v920_v55 }
 0x6a4   :  { %vm980_vm3 = vmor %vm964_vm13, %vm976_vm0  ;;  %vm967_vm0 = vcmp.gt.f32.partialorder %v963_v59, %v920_v55 }
 0x6a5   :  { %v1146_v4 = vsel %vm980_vm3, 1.0, %v1493_v31  ;;  %vm977_vm6 = vmand %vm969_vm15, %vm973_vm12 }
 0x6a6   :  { %v993_v42 = vsel %vm992_vm1, %v1146_v4, 0.0  ;;  %vm981_vm8 = vmor %vm965_vm2, %vm977_vm6  ;;  %vm1013_vm2 = vcmask 7168  }
 0x6a7   :  { %994 = vadd.xlane.f32.xlu0 %v993_v42  ;;  %v1147_v62 = vsel %vm981_vm8, 1.0, %v1493_v31  ;;  %vm978_vm11 = vmand %vm970_vm4, %vm974_vm5 }
 0x6a8   :  { %vm982_vm14 = vmor %vm966_vm7, %vm978_vm11  ;;  %v996_v36 = vsel %vm992_vm1, %v1147_v62, 0.0 }
 0x6a9   :  { %vm979_vm13 = vmand %vm971_vm9, %vm975_vm10  ;;  %v1148_v63 = vsel %vm982_vm14, 1.0, %v1493_v31 }
 0x6aa   :  { %vm983_vm3 = vmor %vm967_vm0, %vm979_vm13  ;;  %v999_v0 = vsel %vm992_vm1, %v1148_v63, 0.0 }
 0x6ab   :  { %997 = vadd.xlane.f32.xlu0 %v996_v36  ;;  %v1149_v5 = vsel %vm983_vm3, 1.0, %v1493_v31 }
 0x6ac   :  { %v1002_v16 = vsel %vm992_vm1, %v1149_v5, 0.0 }
 0x6af   :  { %1000 = vadd.xlane.f32.xlu0 %v999_v0 }
 0x6b3   :  { %1003 = vadd.xlane.f32.xlu0 %v1002_v16 }
 0x734   :  { %v995_v17 = vpop.xlane.xlu0 %994 }
 0x735   :  { %vm1005_vm12 = vcmp.lt.f32.partialorder %v995_v17, 20.0 }
 0x736   :  { %v1009_v6 = vsel %vm1005_vm12, %v914_v46, 0.0 }
 0x737   :  { %v1014_v10 = vsel %vm1013_vm2, %v1009_v6, 0.0 }
 0x738   :  { %v998_v2 = vpop.xlane.xlu0 %997 }
 0x739   :  { %vm1006_vm15 = vcmp.lt.f32.partialorder %v998_v2, 20.0 }
 0x73a   :  { %v1010_v3 = vsel %vm1006_vm15, %v916_v49, 0.0 }
 0x73b   :  { %v1015_v8 = vsel %vm1013_vm2, %v1010_v3, 0.0 }
 0x73c   :  { %v1001_v7 = vpop.xlane.xlu0 %1000  ;;  %v1016_v12 = vadd.f32 %v1015_v8, %v1014_v10 }
 0x73d   :  { %vm1007_vm4 = vcmp.lt.f32.partialorder %v1001_v7, 20.0 }
 0x73e   :  { %v1011_v9 = vsel %vm1007_vm4, %v918_v52, 0.0 }
 0x73f   :  { %v1017_v11 = vsel %vm1013_vm2, %v1011_v9, 0.0 }
 0x740   :  { %v1004_v13 = vpop.xlane.xlu0 %1003  ;;  %v1018_v15 = vadd.f32 %v1017_v11, %v1016_v12 }
 0x741   :  { %vm1008_vm5 = vcmp.lt.f32.partialorder %v1004_v13, 20.0 }
 0x742   :  { %v1012_v14 = vsel %vm1008_vm5, %v920_v55, 0.0 }
 0x743   :  { %v1019_v18 = vsel %vm1013_vm2, %v1012_v14, 0.0 }
 0x744   :  { %v1020_v19 = vadd.f32 %v1019_v18, %v1018_v15 }
 0x746   :  { %1021 = vadd.xlane.f32.xlu0 %v1020_v19 }
 0x74a   :  { %1042 = vadd.xlane.f32.xlu0 %v1612_v1 }
 0x74b   :  { %1451 = shalt.err (!%p1448_p12)
}
 0x74c   :  { %s1452_s17 = scalar_lea.hbm %s1654_s4, 512 }
 0x74d   :  { %p1453_p13 = scmp.ne.s32.totalorder %s1654_s4, %s1452_s17  ;;  %p1456_p0 = scmp.lt.u32.totalorder %s1452_s17, %s1654_s4 }
 0x74f   :  { %p1458_p1 = pnand %p1456_p0, %p1453_p13 }
 0x751   :  { %1461 = shalt.err (!%p1458_p1)
}
 0x752   :  { %s1495_s21 = smov 128   ;;  %s1496_s22 = smov 8   ;;  %vm1055_vm1 = vcmask 0  }
 0x753   :  { %1068 = dma.vmem_to_hbm [thread:$0]  %s1063_s14, 512, %s1654_s4, [#allocation4], %s1495_s21, %s1495_s21, %s1496_s22  }
 0x754   :  { %s1497_s4 = smov [#allocation6]  }
 0x755   :  { %s1077_s27 = sshll.u32 %s1497_s4, 4  ;;  %s1078_s27 = int_to_ptr.vmem [resolvable:$true] %s1077_s27 }
 0x756   :  { %s1462_s28 = scalar_lea.vmem %s1078_s27, 16  ;;  %s1466_s29 = scalar_lea.vmem %s1078_s27, 32 }
 0x757   :  { %p1463_p2 = scmp.ne.s32.totalorder %s1078_s27, %s1462_s28  ;;  %p1467_p3 = scmp.lt.s32.totalorder %s1078_s27, %s1078_s27 }
 0x758   :  { %p1468_p4 = scmp.lt.s32.totalorder %s1466_s29, %s1462_s28 }
 0x75a   :  { %p1469_p5 = por %p1468_p4, %p1467_p3 }
 0x75c   :  { %p1470_p6 = pnand %p1469_p5, %p1463_p2 }
 0x7d3   :  { %v1022_v1 = vpop.xlane.xlu0 %1021 }
 0x7d4   :  { %v1023_v20 = vrot.slane %v1022_v1, 4 }
 0x7d6   :  { %v1024_v21 = vadd.f32 %v1023_v20, %v1022_v1 }
 0x7d7   :  { %v1043_v22 = vpop.xlane.xlu0 %1042 }
 0x7d8   :  { %v1025_v23 = vrot.slane %v1024_v21, 2  ;;  %v1044_v24 = vrot.slane %v1043_v22, 4 }
 0x7da   :  { %v1045_v25 = vadd.f32 %v1044_v24, %v1043_v22  ;;  %v1026_v26 = vadd.f32 %v1025_v23, %v1024_v21 }
 0x7dc   :  { %v1046_v27 = vrot.slane %v1045_v25, 2  ;;  %v1027_v28 = vrot.slane %v1026_v26, 1 }
 0x7de   :  { %v1047_v29 = vadd.f32 %v1046_v27, %v1045_v25  ;;  %v1028_v30 = vadd.f32 %v1027_v28, %v1026_v26 }
 0x7e0   :  { %1332 = vpush %v1028_v30  ;;  %v1048_v32 = vrot.slane %v1047_v29, 1 }
 0x7e2   :  { %v1049_v33 = vadd.f32 %v1048_v32, %v1047_v29 }
 0x7e4   :  { %1334 = vpush %v1049_v33 }
 0x811   :  { %s1333_s25 = spop %1332 }
 0x812   :  { %v1030_v34 = vstv %s1333_s25 }
 0x813   :  { %v1053_v37 = vmul.f32 0.1, %v1030_v34 }
 0x815   :  { %s1335_s26 = spop %1334 }
 0x816   :  { %v1051_v35 = vstv %s1335_s26 }
 0x817   :  { %v1052_v38 = vmul.f32 0.00048828125, %v1051_v35 }
 0x819   :  { %v1054_v39 = vadd.f32 %v1053_v37, %v1052_v38 }
 0x81b   :  { %1056 = vst.msk [vmem:[#allocation6] sm:$0x1] %vm1055_vm1, %v1054_v39 }
 0x81c   :  { %1473 = shalt.err (!%p1470_p6)
}
 0x81d   :  { %s1474_s7 = scalar_lea.hbm %s1656_s6, 16 }
 0x81e   :  { %p1475_p7 = scmp.ne.s32.totalorder %s1656_s6, %s1474_s7  ;;  %p1478_p8 = scmp.lt.u32.totalorder %s1474_s7, %s1656_s6 }
 0x820   :  { %p1480_p9 = pnand %p1478_p8, %p1475_p7 }
 0x822   :  { %1483 = shalt.err (!%p1480_p9)
}
 0x823   :  { %1080 = dma.vmem_to_hbm [thread:$0]  %s1078_s27, 16, %s1656_s6, [#allocation7]  }
 0x824   :  { %1486 = dma.done.wait [#allocation4], 512  }
 0x825   :  { %1487 = vsyncadd [#allocation4], 4294966784 }
 0x826   :  { %1488 = dma.done.wait [#allocation7], 16  }
 0x827   :  { %1489 = vsyncadd [#allocation7], 4294967280 }
 0x828   :  { %1089 = vsyncpa [#allocation3], 1 }
 0x829   :  { %1090 = vsyncpa [#allocation4], 1 }
 0x82a   :  { %1091 = vsyncpa [#allocation7], 1 }

</bundles_post_ra>
